<compile_context>
chip_gen: v6e
topology: v6e:2x2x1
jax: 0.10.0
libtpu: 0.0.40
codegen_flags: <defaults>
</compile_context>

<pallas_src>
import functools
import math

import jax
import jax.numpy as jnp
from jax.experimental import pallas as pl
from jax.experimental.pallas import tpu as pltpu


# ----------------------------- kernel bodies ------------------------------ #

def _ek_single_bias(x_ref, wt_ref, b_ref, o_ref, *, scale, lr_mul):
    # Whole reduction in one K block: no scratch accumulator needed.
    acc = jnp.dot(x_ref[...], wt_ref[...], preferred_element_type=jnp.float32)
    o_ref[...] = (acc * scale
                  + b_ref[...].astype(jnp.float32) * lr_mul).astype(o_ref.dtype)


def _ek_single_nobias(x_ref, wt_ref, o_ref, *, scale):
    acc = jnp.dot(x_ref[...], wt_ref[...], preferred_element_type=jnp.float32)
    o_ref[...] = (acc * scale).astype(o_ref.dtype)


def _ek_multi_bias(x_ref, wt_ref, b_ref, o_ref, acc_ref, *, scale, lr_mul):
    k = pl.program_id(2)

    @pl.when(k == 0)
    def _():
        acc_ref[...] = jnp.zeros_like(acc_ref)

    acc_ref[...] += jnp.dot(x_ref[...], wt_ref[...],
                            preferred_element_type=jnp.float32)

    @pl.when(k == pl.num_programs(2) - 1)
    def _():
        o_ref[...] = (acc_ref[...] * scale
                      + b_ref[...].astype(jnp.float32) * lr_mul
                      ).astype(o_ref.dtype)


def _ek_multi_nobias(x_ref, wt_ref, o_ref, acc_ref, *, scale):
    k = pl.program_id(2)

    @pl.when(k == 0)
    def _():
        acc_ref[...] = jnp.zeros_like(acc_ref)

    acc_ref[...] += jnp.dot(x_ref[...], wt_ref[...],
                            preferred_element_type=jnp.float32)

    @pl.when(k == pl.num_programs(2) - 1)
    def _():
        o_ref[...] = (acc_ref[...] * scale).astype(o_ref.dtype)


# ----------------------------- tiling helpers ----------------------------- #

def _round_up(x, m):
    return -(-x // m) * m


def _tile_and_pad(dim, base, cap):
    """Pick a (base-aligned) tile <= cap and the padded dim it divides."""
    padded = _round_up(dim, base)
    tile = min(padded, cap)          # cap is a multiple of base
    padded = _round_up(padded, tile)
    return tile, padded


def _hw_tile_caps(itemsize):
    """Generation-aware VMEM budget and tile caps (v5e/v6e vs v7x)."""
    try:
        info = pltpu.get_tpu_info()
        vmem_cap = int(getattr(info, "vmem_capacity_bytes", 64 * 1024 * 1024))
    except Exception:
        vmem_cap = 64 * 1024 * 1024  # conservative: assume v7x-sized VMEM
    if vmem_cap >= 100 * 1024 * 1024:
        # v5e / v6e: 128 MiB VMEM -> large tiles, raise the scoped limit.
        vmem_limit = 96 * 1024 * 1024
        tm_cap = tn_cap = 1024
        tk_cap = 4096 if itemsize <= 2 else 2048
    else:
        # v7x: 64 MiB VMEM per TensorCore -> keep double-buffering comfortable.
        vmem_limit = 48 * 1024 * 1024
        tm_cap = tn_cap = 512
        tk_cap = 2048 if itemsize <= 2 else 1024
    return vmem_limit, tm_cap, tn_cap, tk_cap


# ------------------------------- wrapper ----------------------------------- #

def prepare_equal_linear_weight(weight, mxu_dtype=None):
    """One-time (parameter-load) prep: transpose the PyTorch (out_dim, in_dim)
    weight to (in_dim, out_dim) so the kernel never pays a per-call HBM
    transpose; optionally cast once to the MXU compute dtype (e.g. bf16)."""
    wt = jnp.asarray(weight).T
    if mxu_dtype is not None:
        wt = wt.astype(mxu_dtype)
    return wt


def equal_linear(x, weight_t, bias=None, *, lr_mul=1.0, activation=None,
                 mxu_dtype=None, force_pallas=False):
    """EqualLinear forward.

    x:        (B, ...) -> flattened to (B, in_dim) like input.view(B, -1)
    weight_t: (in_dim, out_dim)  PRE-TRANSPOSED weight (prepare_equal_linear_weight)
    bias:     (out_dim,) or None
    mxu_dtype: optional narrower compute dtype (e.g. jnp.bfloat16) for the MXU
               operands; accumulation stays f32.
    """
    B = x.shape[0]
    x2 = x.reshape(B, -1)
    in_dim, out_dim = weight_t.shape
    assert x2.shape[1] == in_dim, f"in_dim mismatch: {x2.shape[1]} vs {in_dim}"

    out_dtype = x.dtype
    scale = (1.0 / math.sqrt(in_dim)) * lr_mul
    # Per the module: when `activation` is set, the bias is dropped and no
    # nonlinearity is ever applied afterwards.
    # TODO(synk): confirm with the model owner whether fused_lrelu was intended.
    use_bias = (bias is not None) and (activation is None)

    compute_dtype = jnp.dtype(mxu_dtype) if mxu_dtype is not None else x2.dtype
    if x2.dtype != compute_dtype:
        x2 = x2.astype(compute_dtype)
    if weight_t.dtype != compute_dtype:
        weight_t = weight_t.astype(compute_dtype)

    # Tiny shapes (masked <128-lane stores, ~1% MXU fill, launch-latency bound):
    # let XLA fuse a plain matmul with neighboring ops instead.
    if not force_pallas and (B < 8 or out_dim < 128):
        out = jnp.dot(x2, weight_t, preferred_element_type=jnp.float32) * scale
        if use_bias:
            out = out + bias.astype(jnp.float32) * lr_mul
        return out.astype(out_dtype)

    itemsize = jnp.dtype(compute_dtype).itemsize
    vmem_limit, tm_cap, tn_cap, tk_cap = _hw_tile_caps(itemsize)

    tm, Mp = _tile_and_pad(B, 8, tm_cap)
    tn, Np = _tile_and_pad(out_dim, 128, tn_cap)
    tk, Kp = _tile_and_pad(in_dim, 128, tk_cap)

    # Keep both TensorCores busy (v7x megacore) when the parallel grid is 1x1.
    if (Mp // tm) * (Np // tn) == 1:
        if tn >= 256:
            tn //= 2
        elif tm >= 16:
            tm //= 2
    grid = (Mp // tm, Np // tn, Kp // tk)
    gk = grid[2]

    # Zero-pad to tile multiples (zeros along K contribute nothing; padded M/N
    # rows/cols are sliced off below). No-op copy is skipped when divisible.
    if (B, in_dim) != (Mp, Kp):
        x2 = jnp.pad(x2, ((0, Mp - B), (0, Kp - in_dim)))
    wt = weight_t
    if (in_dim, out_dim) != (Kp, Np):
        wt = jnp.pad(wt, ((0, Kp - in_dim), (0, Np - out_dim)))

    x_spec = pl.BlockSpec((tm, tk), lambda i, j, k: (i, k))
    w_spec = pl.BlockSpec((tk, tn), lambda i, j, k: (k, j))
    o_spec = pl.BlockSpec((tm, tn), lambda i, j, k: (i, j))

    in_arrays = [x2, wt]
    in_specs = [x_spec, w_spec]
    if use_bias:
        b2 = bias.reshape(1, out_dim)
        if Np != out_dim:
            b2 = jnp.pad(b2, ((0, 0), (0, Np - out_dim)))
        in_arrays.append(b2)
        in_specs.append(pl.BlockSpec((1, tn), lambda i, j, k: (0, j)))

    if gk == 1:
        # Single K block: scratch-free kernel writes the output block directly.
        kernel = (functools.partial(_ek_single_bias, scale=scale, lr_mul=lr_mul)
                  if use_bias else
                  functools.partial(_ek_single_nobias, scale=scale))
        scratch_shapes = []
    else:
        kernel = (functools.partial(_ek_multi_bias, scale=scale, lr_mul=lr_mul)
                  if use_bias else
                  functools.partial(_ek_multi_nobias, scale=scale))
        scratch_shapes = [pltpu.VMEM((tm, tn), jnp.float32)]

    out = pl.pallas_call(
        kernel,
        out_shape=jax.ShapeDtypeStruct((Mp, Np), out_dtype),
        grid_spec=pltpu.PrefetchScalarGridSpec(
            num_scalar_prefetch=0,
            grid=grid,
            in_specs=in_specs,
            out_specs=o_spec,
            scratch_shapes=scratch_shapes,
        ),
        compiler_params=pltpu.CompilerParams(
            dimension_semantics=("parallel", "parallel", "arbitrary"),
            vmem_limit_bytes=vmem_limit,
        ),
    )(*in_arrays)

    if (Mp, Np) != (B, out_dim):
        out = out[:B, :out_dim]
    return out


# ------------------------------ reference ---------------------------------- #

def _reference(x, weight, bias, *, lr_mul=1.0, activation=None, cast_dtype=None):
    B = x.shape[0]
    x2 = x.reshape(B, -1)
    w = weight
    if cast_dtype is not None:
        x2 = x2.astype(cast_dtype)
        w = w.astype(cast_dtype)
    x2 = x2.astype(jnp.float32)
    w = w.astype(jnp.float32)
    in_dim = weight.shape[1]
    scale = (1.0 / math.sqrt(in_dim)) * lr_mul
    out = x2 @ (w * scale).T
    if activation is None and bias is not None:
        out = out + bias.astype(jnp.float32) * lr_mul
    return out


# --------------------------------- test ------------------------------------ #

if __name__ == "__main__":
    key = jax.random.PRNGKey(0)
    k1, k2, k3, k4, k5, k6 = jax.random.split(key, 6)

    # ---- Config A: the module's natural small shapes: (2,4,16,16) -> 1024, 32
    B, C, H, W = 2, 4, 16, 16
    in_a, out_a = C * H * W, 32
    lr_a = 1.0
    x_a = jax.random.normal(k1, (B, C, H, W), dtype=jnp.float32)
    w_a = jax.random.normal(k2, (out_a, in_a), dtype=jnp.float32) / lr_a
    b_a = jnp.full((out_a,), 0.0, dtype=jnp.float32)
    wt_a = prepare_equal_linear_weight(w_a)   # one-time transpose, outside jit

    # Tiny shape -> fused XLA fallback (bias path and activation/no-bias path).
    o = jax.block_until_ready(equal_linear(x_a, wt_a, b_a, lr_mul=lr_a))
    r = _reference(x_a, w_a, b_a, lr_mul=lr_a)
    assert o.shape == (B, out_a)
    assert jnp.allclose(o, r, atol=1e-4, rtol=1e-4), "mismatch: A bias/fallback"

    o = jax.block_until_ready(
        equal_linear(x_a, wt_a, b_a, lr_mul=lr_a, activation="fused_lrelu"))
    r = _reference(x_a, w_a, b_a, lr_mul=lr_a, activation="fused_lrelu")
    assert jnp.allclose(o, r, atol=1e-4, rtol=1e-4), "mismatch: A nobias/fallback"

    # Same shapes, forced through the Pallas kernel (M/N padding, single-K path).
    o = jax.block_until_ready(
        equal_linear(x_a, wt_a, b_a, lr_mul=lr_a, force_pallas=True))
    r = _reference(x_a, w_a, b_a, lr_mul=lr_a)
    assert jnp.allclose(o, r, atol=1e-4, rtol=1e-4), "mismatch: A bias/pallas"

    # ---- Config B: multi-K accumulation path (f32 and bf16 MXU operands) ----
    Bb, in_b, out_b = 16, 4096, 256
    lr_b = 0.5
    x_b = jax.random.normal(k3, (Bb, in_b), dtype=jnp.float32)
    w_b = jax.random.normal(k4, (out_b, in_b), dtype=jnp.float32) / lr_b
    b_b = jnp.full((out_b,), 0.3, dtype=jnp.float32)
    wt_b = prepare_equal_linear_weight(w_b)

    o = jax.block_until_ready(
        equal_linear(x_b, wt_b, b_b, lr_mul=lr_b, force_pallas=True))
    r = _reference(x_b, w_b, b_b, lr_mul=lr_b)
    assert jnp.allclose(o, r, atol=1e-3, rtol=1e-3), "mismatch: B bias/f32"

    o = jax.block_until_ready(
        equal_linear(x_b, wt_b, b_b, lr_mul=lr_b, activation="fused_lrelu",
                     force_pallas=True))
    r = _reference(x_b, w_b, b_b, lr_mul=lr_b, activation="fused_lrelu")
    assert jnp.allclose(o, r, atol=1e-3, rtol=1e-3), "mismatch: B nobias/f32"

    wt_b_bf16 = prepare_equal_linear_weight(w_b, mxu_dtype=jnp.bfloat16)
    o = jax.block_until_ready(
        equal_linear(x_b, wt_b_bf16, b_b, lr_mul=lr_b,
                     mxu_dtype=jnp.bfloat16, force_pallas=True))
    r = _reference(x_b, w_b, b_b, lr_mul=lr_b, cast_dtype=jnp.bfloat16)
    assert jnp.allclose(o, r, atol=1e-2, rtol=1e-2), "mismatch: B bias/bf16"

    # ---- Config C: indivisible dims -> wrapper-side padding + TC split ------
    Bc, in_c, out_c = 10, 1000, 200
    x_c = jax.random.normal(k5, (Bc, in_c), dtype=jnp.float32)
    w_c = jax.random.normal(k6, (out_c, in_c), dtype=jnp.float32)
    b_c = jnp.full((out_c,), -0.1, dtype=jnp.float32)
    wt_c = prepare_equal_linear_weight(w_c)

    o = jax.block_until_ready(equal_linear(x_c, wt_c, b_c, force_pallas=True))
    r = _reference(x_c, w_c, b_c)
    assert o.shape == (Bc, out_c)
    assert jnp.allclose(o, r, atol=1e-4, rtol=1e-4), "mismatch: C padded"

    print("KERNEL_OK")
</pallas_src>

<mosaic_0001>
module attributes {stable_mosaic.version = 11 : i64} {
  func.func @_ek_single_bias(%arg0: i32, %arg1: i32, %arg2: i32, %arg3: memref<8x1024xf32, #tpu.memory_space<vmem>>, %arg4: memref<1024x128xf32, #tpu.memory_space<vmem>>, %arg5: memref<1x128xf32, #tpu.memory_space<vmem>>, %arg6: memref<8x128xf32, #tpu.memory_space<vmem>>) attributes {dimension_semantics = [#tpu.dimension_semantics<parallel>, #tpu.dimension_semantics<parallel>, #tpu.dimension_semantics<arbitrary>], iteration_bounds = array<i64: 1, 1, 1>, scalar_prefetch = 0 : i64, scratch_operands = 0 : i64, tpu.core_type = #tpu.core_type<tc>, window_params = [{transform_indices = @transform_0, window_bounds = array<i64: 8, 1024>}, {transform_indices = @transform_1, window_bounds = array<i64: 1024, 128>}, {transform_indices = @transform_2, window_bounds = array<i64: 1, 128>}, {transform_indices = @transform_3, window_bounds = array<i64: 8, 128>}]} {
    %c0 = arith.constant 0 : index
    %c0_0 = arith.constant 0 : index
    %0 = vector.load %arg3[%c0, %c0_0] : memref<8x1024xf32, #tpu.memory_space<vmem>>, vector<8x1024xf32>
    %c0_1 = arith.constant 0 : index
    %c0_2 = arith.constant 0 : index
    %1 = vector.load %arg4[%c0_1, %c0_2] : memref<1024x128xf32, #tpu.memory_space<vmem>>, vector<1024x128xf32>
    %cst = arith.constant dense<0.000000e+00> : vector<8x128xf32>
    %2 = tpu.matmul %0, %1, %cst {dimension_numbers = #tpu.dot_dimension_numbers<[1], [0], [0], [1], [0, 0, 1, 1], [], []>} : vector<8x1024xf32>, vector<1024x128xf32>, vector<8x128xf32> -> vector<8x128xf32>
    %cst_3 = arith.constant 3.125000e-02 : f32
    %3 = vector.broadcast %cst_3 : f32 to vector<8x128xf32>
    %4 = arith.mulf %2, %3 : vector<8x128xf32>
    %c0_4 = arith.constant 0 : index
    %c0_5 = arith.constant 0 : index
    %5 = vector.load %arg5[%c0_4, %c0_5] : memref<1x128xf32, #tpu.memory_space<vmem>>, vector<1x128xf32>
    %cst_6 = arith.constant 1.000000e+00 : f32
    %6 = vector.broadcast %cst_6 : f32 to vector<1x128xf32>
    %7 = arith.mulf %5, %6 : vector<1x128xf32>
    %8 = vector.broadcast %7 : vector<1x128xf32> to vector<8x128xf32>
    %9 = arith.addf %4, %8 : vector<8x128xf32>
    %c0_7 = arith.constant 0 : index
    %c0_8 = arith.constant 0 : index
    %10 = vector.load %arg6[%c0_7, %c0_8] : memref<8x128xf32, #tpu.memory_space<vmem>>, vector<8x128xf32>
    tpu.vector_store %arg6[%c0_7, %c0_8], %9 {strides = array<i32>} : memref<8x128xf32, #tpu.memory_space<vmem>>, vector<8x128xf32>,
    return
  }
  func.func @transform_0(%arg0: i32, %arg1: i32, %arg2: i32) -> (i32, i32) {
    %c0_i32 = arith.constant 0 : i32
    return %arg0, %arg2 : i32, i32
  }
  func.func @transform_1(%arg0: i32, %arg1: i32, %arg2: i32) -> (i32, i32) {
    %c0_i32 = arith.constant 0 : i32
    return %arg2, %arg1 : i32, i32
  }
  func.func @transform_2(%arg0: i32, %arg1: i32, %arg2: i32) -> (i32, i32) {
    %c0_i32 = arith.constant 0 : i32
    %c0_i32_0 = arith.constant 0 : i32
    return %c0_i32, %arg1 : i32, i32
  }
  func.func @transform_3(%arg0: i32, %arg1: i32, %arg2: i32) -> (i32, i32) {
    %c0_i32 = arith.constant 0 : i32
    return %arg0, %arg1 : i32, i32
  }
}

</mosaic_0001>

<bundles_post_ra>
// kernel: tpu_custom_call.1
= control target key start
LH: loop header
LB: loop body
LE: loop exit
PB: predicated region body
PF: predicated region fallthrough
CT: control target
= control target key end

     0   :  { %8 = vsyncpa [#allocation3], 0  ;;  %s732_s0 = inlined_call_operand.hbm [shape: f32[8,1024], index: 0, kind: input, shape index: {}]   ;;  %s733_s1 = inlined_call_operand.hbm [shape: f32[1024,128], index: 1, kind: input, shape index: {}]   ;;  %s734_s2 = inlined_call_operand.vmem [shape: f32[1,128], index: 2, kind: input, shape index: {}]   ;;  %s735_s3 = inlined_call_operand.hbm [shape: f32[8,128], index: 3, kind: output, shape index: {}]  }
   0x1   :  { %9 = vsyncpa [#allocation6], 0 }
   0x2   :  { %10 = vsyncpa [#allocation4], 0  ;;  %s695_s12 = smov [#allocation2]   ;;  %s696_s14 = smov [#allocation5]  }
   0x3   :  { %s17_s13 = sshll.u32 %s695_s12, 4  ;;  %s26_s15 = sshll.u32 %s696_s14, 4  ;;  %s18_s13 = int_to_ptr.vmem [resolvable:$true] %s17_s13  ;;  %s27_s15 = int_to_ptr.vmem [resolvable:$true] %s26_s15 }
   0x4   :  { %s637_s16 = scalar_lea.vmem %s18_s13, 1024  ;;  %p642_p1 = scmp.lt.s32.totalorder %s18_s13, %s18_s13 }
   0x5   :  { %p638_p0 = scmp.ne.s32.totalorder %s18_s13, %s637_s16  ;;  %p643_p2 = scmp.lt.s32.totalorder %s637_s16, %s637_s16 }
   0x7   :  { %p644_p3 = por %p643_p2, %p642_p1 }
   0x9   :  { %p645_p4 = pnand %p644_p3, %p638_p0 }
   0xb   :  { %648 = shalt.err (!%p645_p4)
}
   0xc   :  { %20 = dma.hbm_to_vmem [thread:$0]  %s732_s0, 1024, %s18_s13, [#allocation3]  }
   0xd   :  { %s657_s19 = scalar_lea.vmem %s27_s15, 16384  ;;  %p662_p6 = scmp.lt.s32.totalorder %s27_s15, %s27_s15 }
   0xe   :  { %p658_p5 = scmp.ne.s32.totalorder %s27_s15, %s657_s19  ;;  %p663_p7 = scmp.lt.s32.totalorder %s657_s19, %s657_s19 }
  0x10   :  { %p664_p8 = por %p663_p7, %p662_p6 }
  0x12   :  { %p665_p9 = pnand %p664_p8, %p658_p5 }
  0x14   :  { %668 = shalt.err (!%p665_p9)
}
  0x15   :  { %s697_s20 = smov 128   ;;  %s698_s21 = smov 8  }
  0x16   :  { %32 = dma.hbm_to_vmem [thread:$0]  %s733_s1, 16384, %s27_s15, [#allocation6], %s697_s20, %s697_s20, %s698_s21  }
  0x17   :  { %689 = dma.done.wait [#allocation3], 1024  }
  0x18   :  { %690 = vsyncadd [#allocation3], 4294966272 }
  0x19   :  { %691 = dma.done.wait [#allocation6], 16384  }
  0x1a   :  { %692 = vsyncadd [#allocation6], 4294950912  ;;  %v80_v0 = vld [vmem:[#allocation5 + $0xf8] sm:$0xff]  ;;  %v79_v4 = vld [vmem:[#allocation5 + $0xf0] sm:$0xff]  ;;  %s699_s24 = smov [#allocation7]  }
  0x1b   :  { %v112_v1 = vld [vmem:[#allocation5 + $0x1f8] sm:$0xff]  ;;  %484 = vmatprep.subr.mxu0 %v80_v0  ;;  %v111_v5 = vld [vmem:[#allocation5 + $0x1f0] sm:$0xff]  ;;  %v78_v8 = vld [vmem:[#allocation5 + $0xe8] sm:$0xff]  ;;  %s473_s25 = sshll.u32 %s699_s24, 4  ;;  %s474_s25 = int_to_ptr.vmem [resolvable:$true] %s473_s25 }
  0x1c   :  { %v64_v2 = vld [vmem:[#allocation5 + $0x78] sm:$0xff]  ;;  %519 = vmatprep.subr.mxu1 %v112_v1  ;;  %v63_v6 = vld [vmem:[#allocation5 + $0x70] sm:$0xff]  ;;  %v110_v9 = vld [vmem:[#allocation5 + $0x1e8] sm:$0xff]  ;;  %s669_s26 = scalar_lea.vmem %s474_s25, 128  ;;  %p674_p11 = scmp.lt.s32.totalorder %s474_s25, %s474_s25 }
  0x1d   :  { %v96_v3 = vld [vmem:[#allocation5 + $0x178] sm:$0xff]  ;;  %485 = vmatpush3.msra.mxu0 %v64_v2  ;;  %v95_v7 = vld [vmem:[#allocation5 + $0x170] sm:$0xff]  ;;  %v62_v10 = vld [vmem:[#allocation5 + $0x68] sm:$0xff]  ;;  %p670_p10 = scmp.ne.s32.totalorder %s474_s25, %s669_s26  ;;  %p675_p12 = scmp.lt.s32.totalorder %s669_s26, %s669_s26 }
  0x1e   :  { %520 = vmatpush3.msra.mxu1 %v96_v3  ;;  %486 = vmatprep.subr.mxu0 %v79_v4  ;;  %v94_v11 = vld [vmem:[#allocation5 + $0x168] sm:$0xff]  ;;  %v77_v12 = vld [vmem:[#allocation5 + $0xe0] sm:$0xff]  ;;  %v76_v16 = vld [vmem:[#allocation5 + $0xd8] sm:$0xff] }
  0x1f   :  { %521 = vmatprep.subr.mxu1 %v111_v5  ;;  %487 = vmatpush3.msra.mxu0 %v63_v6  ;;  %v109_v13 = vld [vmem:[#allocation5 + $0x1e0] sm:$0xff]  ;;  %v108_v17 = vld [vmem:[#allocation5 + $0x1d8] sm:$0xff]  ;;  %v75_v20 = vld [vmem:[#allocation5 + $0xd0] sm:$0xff]  ;;  %p676_p13 = por %p675_p12, %p674_p11 }
  0x20   :  { %522 = vmatpush3.msra.mxu1 %v95_v7  ;;  %488 = vmatprep.subr.mxu0 %v78_v8  ;;  %v61_v14 = vld [vmem:[#allocation5 + $0x60] sm:$0xff]  ;;  %v60_v18 = vld [vmem:[#allocation5 + $0x58] sm:$0xff]  ;;  %v107_v21 = vld [vmem:[#allocation5 + $0x1d0] sm:$0xff] }
  0x21   :  { %523 = vmatprep.subr.mxu1 %v110_v9  ;;  %v93_v15 = vld [vmem:[#allocation5 + $0x160] sm:$0xff]  ;;  %489 = vmatpush3.msra.mxu0 %v62_v10  ;;  %v92_v19 = vld [vmem:[#allocation5 + $0x158] sm:$0xff]  ;;  %v59_v22 = vld [vmem:[#allocation5 + $0x50] sm:$0xff]  ;;  %p677_p0 = pnand %p676_p13, %p670_p10 }
  0x22   :  { %524 = vmatpush3.msra.mxu1 %v94_v11  ;;  %490 = vmatprep.subr.mxu0 %v77_v12  ;;  %v91_v23 = vld [vmem:[#allocation5 + $0x150] sm:$0xff]  ;;  %v74_v24 = vld [vmem:[#allocation5 + $0xc8] sm:$0xff]  ;;  %v73_v28 = vld [vmem:[#allocation5 + $0xc0] sm:$0xff] }
  0x23   :  { %525 = vmatprep.subr.mxu1 %v109_v13  ;;  %491 = vmatpush3.msra.mxu0 %v61_v14  ;;  %v106_v25 = vld [vmem:[#allocation5 + $0x1c8] sm:$0xff]  ;;  %v105_v29 = vld [vmem:[#allocation5 + $0x1c0] sm:$0xff]  ;;  %v72_v32 = vld [vmem:[#allocation5 + $0xb8] sm:$0xff] }
  0x24   :  { %526 = vmatpush3.msra.mxu1 %v93_v15  ;;  %492 = vmatprep.subr.mxu0 %v76_v16  ;;  %v58_v26 = vld [vmem:[#allocation5 + $0x48] sm:$0xff]  ;;  %v57_v30 = vld [vmem:[#allocation5 + $0x40] sm:$0xff]  ;;  %v104_v33 = vld [vmem:[#allocation5 + $0x1b8] sm:$0xff] }
  0x25   :  { %527 = vmatprep.subr.mxu1 %v108_v17  ;;  %493 = vmatpush3.msra.mxu0 %v60_v18  ;;  %v90_v27 = vld [vmem:[#allocation5 + $0x148] sm:$0xff]  ;;  %v89_v31 = vld [vmem:[#allocation5 + $0x140] sm:$0xff]  ;;  %v56_v34 = vld [vmem:[#allocation5 + $0x38] sm:$0xff] }
  0x26   :  { %528 = vmatpush3.msra.mxu1 %v92_v19  ;;  %494 = vmatprep.subr.mxu0 %v75_v20  ;;  %v88_v35 = vld [vmem:[#allocation5 + $0x138] sm:$0xff]  ;;  %v71_v36 = vld [vmem:[#allocation5 + $0xb0] sm:$0xff]  ;;  %v70_v40 = vld [vmem:[#allocation5 + $0xa8] sm:$0xff] }
  0x27   :  { %529 = vmatprep.subr.mxu1 %v107_v21  ;;  %495 = vmatpush3.msra.mxu0 %v59_v22  ;;  %v103_v37 = vld [vmem:[#allocation5 + $0x1b0] sm:$0xff]  ;;  %v102_v41 = vld [vmem:[#allocation5 + $0x1a8] sm:$0xff]  ;;  %v69_v44 = vld [vmem:[#allocation5 + $0xa0] sm:$0xff] }
  0x28   :  { %530 = vmatpush3.msra.mxu1 %v91_v23  ;;  %496 = vmatprep.subr.mxu0 %v74_v24  ;;  %v55_v38 = vld [vmem:[#allocation5 + $0x30] sm:$0xff]  ;;  %v54_v42 = vld [vmem:[#allocation5 + $0x28] sm:$0xff]  ;;  %v101_v45 = vld [vmem:[#allocation5 + $0x1a0] sm:$0xff] }
  0x29   :  { %531 = vmatprep.subr.mxu1 %v106_v25  ;;  %497 = vmatpush3.msra.mxu0 %v58_v26  ;;  %v87_v39 = vld [vmem:[#allocation5 + $0x130] sm:$0xff]  ;;  %v86_v43 = vld [vmem:[#allocation5 + $0x128] sm:$0xff]  ;;  %v53_v46 = vld [vmem:[#allocation5 + $0x20] sm:$0xff] }
  0x2a   :  { %532 = vmatpush3.msra.mxu1 %v90_v27  ;;  %498 = vmatprep.subr.mxu0 %v73_v28  ;;  %v85_v47 = vld [vmem:[#allocation5 + $0x120] sm:$0xff]  ;;  %v68_v48 = vld [vmem:[#allocation5 + $0x98] sm:$0xff]  ;;  %v67_v52 = vld [vmem:[#allocation5 + $0x90] sm:$0xff] }
  0x2b   :  { %533 = vmatprep.subr.mxu1 %v105_v29  ;;  %499 = vmatpush3.msra.mxu0 %v57_v30  ;;  %v100_v49 = vld [vmem:[#allocation5 + $0x198] sm:$0xff]  ;;  %v99_v53 = vld [vmem:[#allocation5 + $0x190] sm:$0xff]  ;;  %v66_v56 = vld [vmem:[#allocation5 + $0x88] sm:$0xff] }
  0x2c   :  { %534 = vmatpush3.msra.mxu1 %v89_v31  ;;  %500 = vmatprep.subr.mxu0 %v72_v32  ;;  %v52_v50 = vld [vmem:[#allocation5 + $0x18] sm:$0xff]  ;;  %v51_v54 = vld [vmem:[#allocation5 + $0x10] sm:$0xff]  ;;  %v98_v57 = vld [vmem:[#allocation5 + $0x188] sm:$0xff] }
  0x2d   :  { %535 = vmatprep.subr.mxu1 %v104_v33  ;;  %501 = vmatpush3.msra.mxu0 %v56_v34  ;;  %v84_v51 = vld [vmem:[#allocation5 + $0x118] sm:$0xff]  ;;  %v83_v55 = vld [vmem:[#allocation5 + $0x110] sm:$0xff]  ;;  %v50_v58 = vld [vmem:[#allocation5 + $0x8] sm:$0xff] }
  0x2e   :  { %536 = vmatpush3.msra.mxu1 %v88_v35  ;;  %502 = vmatprep.subr.mxu0 %v71_v36  ;;  %v82_v59 = vld [vmem:[#allocation5 + $0x108] sm:$0xff]  ;;  %v65_v60 = vld [vmem:[#allocation5 + $0x80] sm:$0xff]  ;;  %v44_v1 = vld [vmem:[#allocation2 + $0x18] sm:$0xff] }
  0x2f   :  { %537 = vmatprep.subr.mxu1 %v103_v37  ;;  %503 = vmatpush3.msra.mxu0 %v55_v38  ;;  %v97_v61 = vld [vmem:[#allocation5 + $0x180] sm:$0xff]  ;;  %v42_v63 = vld [vmem:[#allocation2 + $0x8] sm:$0xff]  ;;  %v43_v3 = vld [vmem:[#allocation2 + $0x10] sm:$0xff] }
  0x30   :  { %538 = vmatpush3.msra.mxu1 %v87_v39  ;;  %504 = vmatprep.subr.mxu0 %v70_v40  ;;  %v49_v62 = vld [vmem:[#allocation5] sm:$0xff]  ;;  %v144_v4 = vld [vmem:[#allocation5 + $0x2f8] sm:$0xff]  ;;  %v143_v8 = vld [vmem:[#allocation5 + $0x2f0] sm:$0xff] }
  0x31   :  { %539 = vmatprep.subr.mxu1 %v102_v41  ;;  %505 = vmatpush3.msra.mxu0 %v54_v42  ;;  %v81_v0 = vld [vmem:[#allocation5 + $0x100] sm:$0xff]  ;;  %v176_v5 = vld [vmem:[#allocation5 + $0x3f8] sm:$0xff]  ;;  %v175_v9 = vld [vmem:[#allocation5 + $0x3f0] sm:$0xff] }
  0x32   :  { %540 = vmatpush3.msra.mxu1 %v86_v43  ;;  %506 = vmatprep.subr.mxu0 %v69_v44  ;;  %v41_v2 = vld [vmem:[#allocation2] sm:$0xff]  ;;  %v128_v6 = vld [vmem:[#allocation5 + $0x278] sm:$0xff]  ;;  %v127_v10 = vld [vmem:[#allocation5 + $0x270] sm:$0xff] }
  0x33   :  { %541 = vmatprep.subr.mxu1 %v101_v45  ;;  %507 = vmatpush3.msra.mxu0 %v53_v46  ;;  %v160_v7 = vld [vmem:[#allocation5 + $0x378] sm:$0xff]  ;;  %v159_v11 = vld [vmem:[#allocation5 + $0x370] sm:$0xff]  ;;  %v142_v12 = vld [vmem:[#allocation5 + $0x2e8] sm:$0xff] }
  0x34   :  { %542 = vmatpush3.msra.mxu1 %v85_v47  ;;  %508 = vmatprep.subr.mxu0 %v68_v48  ;;  %v174_v13 = vld [vmem:[#allocation5 + $0x3e8] sm:$0xff]  ;;  %v141_v16 = vld [vmem:[#allocation5 + $0x2e0] sm:$0xff]  ;;  %v140_v20 = vld [vmem:[#allocation5 + $0x2d8] sm:$0xff] }
  0x35   :  { %543 = vmatprep.subr.mxu1 %v100_v49  ;;  %509 = vmatpush3.msra.mxu0 %v52_v50  ;;  %v126_v14 = vld [vmem:[#allocation5 + $0x268] sm:$0xff]  ;;  %v173_v17 = vld [vmem:[#allocation5 + $0x3e0] sm:$0xff]  ;;  %v172_v21 = vld [vmem:[#allocation5 + $0x3d8] sm:$0xff] }
  0x36   :  { %544 = vmatpush3.msra.mxu1 %v84_v51  ;;  %510 = vmatprep.subr.mxu0 %v67_v52  ;;  %v158_v15 = vld [vmem:[#allocation5 + $0x368] sm:$0xff]  ;;  %v125_v18 = vld [vmem:[#allocation5 + $0x260] sm:$0xff]  ;;  %v124_v22 = vld [vmem:[#allocation5 + $0x258] sm:$0xff] }
  0x37   :  { %545 = vmatprep.subr.mxu1 %v99_v53  ;;  %511 = vmatpush3.msra.mxu0 %v51_v54  ;;  %v157_v19 = vld [vmem:[#allocation5 + $0x360] sm:$0xff]  ;;  %v156_v23 = vld [vmem:[#allocation5 + $0x358] sm:$0xff]  ;;  %v139_v24 = vld [vmem:[#allocation5 + $0x2d0] sm:$0xff] }
  0x38   :  { %546 = vmatpush3.msra.mxu1 %v83_v55  ;;  %512 = vmatprep.subr.mxu0 %v66_v56  ;;  %v171_v25 = vld [vmem:[#allocation5 + $0x3d0] sm:$0xff]  ;;  %v138_v28 = vld [vmem:[#allocation5 + $0x2c8] sm:$0xff]  ;;  %v137_v32 = vld [vmem:[#allocation5 + $0x2c0] sm:$0xff] }
  0x39   :  { %547 = vmatprep.subr.mxu1 %v98_v57  ;;  %513 = vmatpush3.msra.mxu0 %v50_v58  ;;  %v123_v26 = vld [vmem:[#allocation5 + $0x250] sm:$0xff]  ;;  %v170_v29 = vld [vmem:[#allocation5 + $0x3c8] sm:$0xff]  ;;  %v169_v33 = vld [vmem:[#allocation5 + $0x3c0] sm:$0xff] }
  0x3a   :  { %548 = vmatpush3.msra.mxu1 %v82_v59  ;;  %514 = vmatprep.subr.mxu0 %v65_v60  ;;  %v155_v27 = vld [vmem:[#allocation5 + $0x350] sm:$0xff]  ;;  %v122_v30 = vld [vmem:[#allocation5 + $0x248] sm:$0xff]  ;;  %v121_v34 = vld [vmem:[#allocation5 + $0x240] sm:$0xff] }
  0x3b   :  { %549 = vmatprep.subr.mxu1 %v97_v61  ;;  %515 = vmatpush3.msra.mxu0 %v49_v62  ;;  %v154_v31 = vld [vmem:[#allocation5 + $0x348] sm:$0xff]  ;;  %v153_v35 = vld [vmem:[#allocation5 + $0x340] sm:$0xff]  ;;  %v136_v36 = vld [vmem:[#allocation5 + $0x2b8] sm:$0xff] }
  0x3c   :  { %241 = vmatprep.mubr.f32.mxu0 %v42_v63  ;;  %550 = vmatpush3.msra.mxu1 %v81_v0  ;;  %v168_v37 = vld [vmem:[#allocation5 + $0x3b8] sm:$0xff]  ;;  %v135_v40 = vld [vmem:[#allocation5 + $0x2b0] sm:$0xff]  ;;  %v134_v44 = vld [vmem:[#allocation5 + $0x2a8] sm:$0xff] }
  0x3d   :  { %311 = vmatprep.mubr.f32.mxu1 %v44_v1  ;;  %242 = vmatmul.mubr.f32.vlgmr.msra.gmra.mxu0 %v41_v2  ;;  %v120_v38 = vld [vmem:[#allocation5 + $0x238] sm:$0xff]  ;;  %v167_v41 = vld [vmem:[#allocation5 + $0x3b0] sm:$0xff]  ;;  %v166_v45 = vld [vmem:[#allocation5 + $0x3a8] sm:$0xff] }
  0x3e   :  { %312 = vmatmul.mubr.f32.vlgmr.msra.gmra.mxu1 %v43_v3  ;;  %554 = vmatprep.subr.mxu0 %v144_v4  ;;  %v152_v39 = vld [vmem:[#allocation5 + $0x338] sm:$0xff]  ;;  %v119_v42 = vld [vmem:[#allocation5 + $0x230] sm:$0xff]  ;;  %v118_v46 = vld [vmem:[#allocation5 + $0x228] sm:$0xff] }
  0x3f   :  { %589 = vmatprep.subr.mxu1 %v176_v5  ;;  %555 = vmatpush3.msra.mxu0 %v128_v6  ;;  %v151_v43 = vld [vmem:[#allocation5 + $0x330] sm:$0xff]  ;;  %v150_v47 = vld [vmem:[#allocation5 + $0x328] sm:$0xff]  ;;  %v133_v48 = vld [vmem:[#allocation5 + $0x2a0] sm:$0xff] }
  0x40   :  { %590 = vmatpush3.msra.mxu1 %v160_v7  ;;  %556 = vmatprep.subr.mxu0 %v143_v8  ;;  %v165_v49 = vld [vmem:[#allocation5 + $0x3a0] sm:$0xff]  ;;  %v132_v52 = vld [vmem:[#allocation5 + $0x298] sm:$0xff]  ;;  %v131_v56 = vld [vmem:[#allocation5 + $0x290] sm:$0xff] }
  0x41   :  { %591 = vmatprep.subr.mxu1 %v175_v9  ;;  %557 = vmatpush3.msra.mxu0 %v127_v10  ;;  %v117_v50 = vld [vmem:[#allocation5 + $0x220] sm:$0xff]  ;;  %v164_v53 = vld [vmem:[#allocation5 + $0x398] sm:$0xff]  ;;  %v163_v57 = vld [vmem:[#allocation5 + $0x390] sm:$0xff] }
  0x42   :  { %592 = vmatpush3.msra.mxu1 %v159_v11  ;;  %558 = vmatprep.subr.mxu0 %v142_v12  ;;  %v149_v51 = vld [vmem:[#allocation5 + $0x320] sm:$0xff]  ;;  %v116_v54 = vld [vmem:[#allocation5 + $0x218] sm:$0xff]  ;;  %v115_v58 = vld [vmem:[#allocation5 + $0x210] sm:$0xff] }
  0x43   :  { %593 = vmatprep.subr.mxu1 %v174_v13  ;;  %559 = vmatpush3.msra.mxu0 %v126_v14  ;;  %v148_v55 = vld [vmem:[#allocation5 + $0x318] sm:$0xff]  ;;  %v147_v59 = vld [vmem:[#allocation5 + $0x310] sm:$0xff]  ;;  %v130_v60 = vld [vmem:[#allocation5 + $0x288] sm:$0xff] }
  0x44   :  { %594 = vmatpush3.msra.mxu1 %v158_v15  ;;  %560 = vmatprep.subr.mxu0 %v141_v16  ;;  %v162_v61 = vld [vmem:[#allocation5 + $0x388] sm:$0xff]  ;;  %v129_v0 = vld [vmem:[#allocation5 + $0x280] sm:$0xff]  ;;  %v48_v5 = vld [vmem:[#allocation2 + $0x38] sm:$0xff] }
  0x45   :  { %595 = vmatprep.subr.mxu1 %v173_v17  ;;  %561 = vmatpush3.msra.mxu0 %v125_v18  ;;  %v114_v62 = vld [vmem:[#allocation5 + $0x208] sm:$0xff]  ;;  %v161_v1 = vld [vmem:[#allocation5 + $0x380] sm:$0xff]  ;;  %v47_v7 = vld [vmem:[#allocation2 + $0x30] sm:$0xff] }
  0x46   :  { %596 = vmatpush3.msra.mxu1 %v157_v19  ;;  %562 = vmatprep.subr.mxu0 %v140_v20  ;;  %v146_v63 = vld [vmem:[#allocation5 + $0x308] sm:$0xff]  ;;  %v113_v2 = vld [vmem:[#allocation5 + $0x200] sm:$0xff] }
  0x47   :  { %597 = vmatprep.subr.mxu1 %v172_v21  ;;  %563 = vmatpush3.msra.mxu0 %v124_v22  ;;  %v46_v3 = vld [vmem:[#allocation2 + $0x28] sm:$0xff]  ;;  %v145_v4 = vld [vmem:[#allocation5 + $0x300] sm:$0xff] }
  0x48   :  { %598 = vmatpush3.msra.mxu1 %v156_v23  ;;  %564 = vmatprep.subr.mxu0 %v139_v24  ;;  %v45_v6 = vld [vmem:[#allocation2 + $0x20] sm:$0xff] }
  0x49   :  { %599 = vmatprep.subr.mxu1 %v171_v25  ;;  %565 = vmatpush3.msra.mxu0 %v123_v26  ;;  %v483_v23 = vld [vmem:[%s734_s2] ss:$0 sm:$0xff] }
  0x4a   :  { %600 = vmatpush3.msra.mxu1 %v155_v27  ;;  %566 = vmatprep.subr.mxu0 %v138_v28 }
  0x4b   :  { %601 = vmatprep.subr.mxu1 %v170_v29  ;;  %567 = vmatpush3.msra.mxu0 %v122_v30 }
  0x4c   :  { %602 = vmatpush3.msra.mxu1 %v154_v31  ;;  %568 = vmatprep.subr.mxu0 %v137_v32 }
  0x4d   :  { %603 = vmatprep.subr.mxu1 %v169_v33  ;;  %569 = vmatpush3.msra.mxu0 %v121_v34 }
  0x4e   :  { %604 = vmatpush3.msra.mxu1 %v153_v35  ;;  %570 = vmatprep.subr.mxu0 %v136_v36 }
  0x4f   :  { %605 = vmatprep.subr.mxu1 %v168_v37  ;;  %571 = vmatpush3.msra.mxu0 %v120_v38 }
  0x50   :  { %606 = vmatpush3.msra.mxu1 %v152_v39  ;;  %572 = vmatprep.subr.mxu0 %v135_v40 }
  0x51   :  { %607 = vmatprep.subr.mxu1 %v167_v41  ;;  %573 = vmatpush3.msra.mxu0 %v119_v42 }
  0x52   :  { %608 = vmatpush3.msra.mxu1 %v151_v43  ;;  %574 = vmatprep.subr.mxu0 %v134_v44 }
  0x53   :  { %609 = vmatprep.subr.mxu1 %v166_v45  ;;  %575 = vmatpush3.msra.mxu0 %v118_v46 }
  0x54   :  { %610 = vmatpush3.msra.mxu1 %v150_v47  ;;  %576 = vmatprep.subr.mxu0 %v133_v48 }
  0x55   :  { %611 = vmatprep.subr.mxu1 %v165_v49  ;;  %577 = vmatpush3.msra.mxu0 %v117_v50 }
  0x56   :  { %612 = vmatpush3.msra.mxu1 %v149_v51  ;;  %578 = vmatprep.subr.mxu0 %v132_v52 }
  0x57   :  { %613 = vmatprep.subr.mxu1 %v164_v53  ;;  %579 = vmatpush3.msra.mxu0 %v116_v54 }
  0x58   :  { %614 = vmatpush3.msra.mxu1 %v148_v55  ;;  %580 = vmatprep.subr.mxu0 %v131_v56 }
  0x59   :  { %615 = vmatprep.subr.mxu1 %v163_v57  ;;  %581 = vmatpush3.msra.mxu0 %v115_v58 }
  0x5a   :  { %616 = vmatpush3.msra.mxu1 %v147_v59  ;;  %582 = vmatprep.subr.mxu0 %v130_v60 }
  0x5b   :  { %617 = vmatprep.subr.mxu1 %v162_v61  ;;  %583 = vmatpush3.msra.mxu0 %v114_v62 }
  0x5c   :  { %618 = vmatpush3.msra.mxu1 %v146_v63  ;;  %584 = vmatprep.subr.mxu0 %v129_v0 }
  0x5d   :  { %619 = vmatprep.subr.mxu1 %v161_v1  ;;  %585 = vmatpush3.msra.mxu0 %v113_v2 }
  0x5e   :  { %381 = vmatprep.mubr.f32.mxu0 %v46_v3  ;;  %620 = vmatpush3.msra.mxu1 %v145_v4 }
  0x5f   :  { %451 = vmatprep.mubr.f32.mxu1 %v48_v5  ;;  %382 = vmatmul.mubr.f32.vlgmr.msra.gmra.mxu0 %v45_v6 }
  0x60   :  { %452 = vmatmul.mubr.f32.vlgmr.msra.gmra.mxu1 %v47_v7 }
  0xfd   :  { %v516_v8 = vpop.f32.mrf.mxu0 }
  0xfe   :  { %v551_v9 = vpop.f32.mrf.mxu1 }
  0xff   :  { %v517_v10 = vpop.f32.mrf.mxu0 }
 0x100   :  { %v552_v11 = vpop.f32.mrf.mxu1  ;;  %v518_v12 = vadd.f32 %v517_v10, %v516_v8 }
 0x101   :  { %v553_v13 = vadd.f32 %v552_v11, %v551_v9 }
 0x103   :  { %v314_v18 = vadd.f32 %v553_v13, %v518_v12 }
 0x11f   :  { %v586_v14 = vpop.f32.mrf.mxu0 }
 0x120   :  { %v621_v15 = vpop.f32.mrf.mxu1 }
 0x121   :  { %v587_v16 = vpop.f32.mrf.mxu0 }
 0x122   :  { %v622_v17 = vpop.f32.mrf.mxu1  ;;  %v588_v19 = vadd.f32 %v587_v16, %v586_v14 }
 0x123   :  { %v623_v21 = vadd.f32 %v622_v17, %v621_v15 }
 0x124   :  { %v384_v20 = vadd.f32 %v588_v19, %v314_v18 }
 0x126   :  { %v454_v22 = vadd.f32 %v623_v21, %v384_v20 }
 0x128   :  { %v457_v24 = vmul.f32 0.03125, %v454_v22 }
 0x12a   :  { %v465_v25 = vadd.f32 %v483_v23, %v457_v24 }
 0x12c   :  { %466 = vst [vmem:[#allocation7] sm:$0xff] %v465_v25 }
 0x12d   :  { %680 = shalt.err (!%p677_p0)
}
 0x12e   :  { %476 = dma.vmem_to_hbm [thread:$0]  %s474_s25, 128, %s735_s3, [#allocation4]  }
 0x12f   :  { %693 = dma.done.wait [#allocation4], 128  }
 0x130   :  { %694 = vsyncadd [#allocation4], 4294967168 }
 0x131   :  { %480 = vsyncpa [#allocation3], 1 }
 0x132   :  { %481 = vsyncpa [#allocation6], 1 }
 0x133   :  { %482 = vsyncpa [#allocation4], 1 }

</bundles_post_ra>
